<compile_context>
chip_gen: v6e
topology: v6e:2x2x1
jax: 0.10.0
libtpu: 0.0.40
codegen_flags: <defaults>
</compile_context>

<pallas_src>
import functools

import jax
import jax.numpy as jnp
from jax import lax
from jax.experimental import pallas as pl
from jax.experimental.pallas import tpu as pltpu


def _channel_attention_kernel(x_ref, w1t_ref, w2t_ref, o_ref,
                              sum_acc, max_acc, *, hw_total, hw_tile, mask_hw):
    # x_ref:   (TB, C, hw_tile)  current batch-block / spatial tile (native layout)
    # w1t_ref: (C, mid)          fc1 weight, transposed
    # w2t_ref: (mid, C)          fc2 weight, transposed
    # o_ref:   (TB, C)           lane-dense output block (written on last HW step)
    # sum_acc / max_acc: (TB, C) f32 running pooling accumulators
    hi = pl.program_id(1)

    @pl.when(hi == 0)
    def _init():
        sum_acc[...] = jnp.zeros_like(sum_acc)
        max_acc[...] = jnp.full_like(max_acc, -jnp.inf)

    x = x_ref[...].astype(jnp.float32)                      # (TB, C, hw_tile)

    if mask_hw:
        # Mask padded spatial columns: zeros for the sum, -inf for the max; the
        # mean divides by the true H*W below.
        col = hi * hw_tile + lax.broadcasted_iota(jnp.int32, x.shape, 2)
        valid = col < hw_total
        x_sum = jnp.where(valid, x, 0.0)
        x_max = jnp.where(valid, x, -jnp.inf)
    else:
        x_sum = x
        x_max = x

    # Minor-axis reductions: VPU adds/maxes across vregs + a tiny lane-reduce tail.
    sum_acc[...] = sum_acc[...] + jnp.sum(x_sum, axis=2)
    max_acc[...] = jnp.maximum(max_acc[...], jnp.max(x_max, axis=2))

    @pl.when(hi == pl.num_programs(1) - 1)
    def _finalize():
        avg = sum_acc[...] * (1.0 / float(hw_total))        # true-HW mean
        pooled = avg + max_acc[...]                         # (TB, C)
        w1t = w1t_ref[...].astype(jnp.float32)              # (C, mid)
        w2t = w2t_ref[...].astype(jnp.float32)              # (mid, C)
        # fc1 fused over avg/max (no bias / activation between pools and fc1).
        h = jnp.dot(pooled, w1t, preferred_element_type=jnp.float32)   # (TB, mid)
        out = jnp.dot(h, w2t, preferred_element_type=jnp.float32)      # (TB, C)
        o_ref[...] = jax.nn.sigmoid(out).astype(o_ref.dtype)


def channel_attention(x, w1, w2, *, tb=None, hw_tile=None, tile_bytes=4 << 20):
    """x: (B, C, H, W) NCHW; w1: (mid, C) fc1 weight; w2: (C, mid) fc2 weight.
    Returns (B, C, 1, 1), matching the PyTorch module."""
    B, C, H, W = x.shape
    mid = w1.shape[0]
    HW = H * W
    itemsize = jnp.dtype(x.dtype).itemsize

    # Free reshape: HW is already contiguous in NCHW.  Channels on sublanes,
    # spatial on lanes inside the kernel.
    x_r = x.reshape(B, C, HW)

    # Batch tile: full batch when small (no pad); 8-row blocks otherwise so the
    # output block keeps sublane alignment.
    if tb is None:
        tb = B if B <= 8 else 8
    tb = min(tb, B)
    Bp = pl.cdiv(B, tb) * tb
    if Bp != B:
        x_r = jnp.pad(x_r, ((0, Bp - B), (0, 0), (0, 0)))

    # Spatial (lane) tile: take the whole HW extent in one step when it fits the
    # per-tile budget (no padding, no masking); otherwise stream 128-aligned tiles.
    if hw_tile is None:
        if tb * C * HW * itemsize <= tile_bytes:
            hw_tile = HW
        else:
            hw_tile = max(128, ((tile_bytes // (tb * C * itemsize)) // 128) * 128)
    if hw_tile >= HW:
        hw_tile = HW
    HWp = pl.cdiv(HW, hw_tile) * hw_tile
    if HWp != HW:
        x_r = jnp.pad(x_r, ((0, 0), (0, 0), (0, HWp - HW)))

    w1t = w1.T                                            # (C, mid)
    w2t = w2.T                                            # (mid, C)

    grid = (Bp // tb, HWp // hw_tile)                     # HW reduction axis last

    kernel = functools.partial(
        _channel_attention_kernel,
        hw_total=HW, hw_tile=hw_tile, mask_hw=(HWp != HW))

    # Explicit VMEM budget: double-buffered x tiles + weights + output block +
    # accumulators + headroom; capped well under v7x's 64 MiB physical VMEM.
    x_tile_bytes = tb * C * hw_tile * itemsize
    w_bytes = 2 * C * mid * itemsize
    vmem_bytes = (2 * x_tile_bytes
                  + 2 * w_bytes
                  + 2 * tb * C * itemsize
                  + 2 * tb * C * 4
                  + (2 << 20))
    vmem_bytes = int(min(max(vmem_bytes, 8 << 20), 48 << 20))

    # Memory-bound streaming reduction: tell XLA so it schedules around it.
    cost = pl.CostEstimate(
        flops=2 * B * C * HW + 4 * B * C * mid,
        transcendentals=B * C,
        bytes_accessed=B * C * HW * itemsize + 2 * C * mid * itemsize
                       + B * C * itemsize,
    )

    out = pl.pallas_call(
        kernel,
        out_shape=jax.ShapeDtypeStruct((Bp, C), x.dtype),
        grid_spec=pltpu.PrefetchScalarGridSpec(
            num_scalar_prefetch=0,
            grid=grid,
            in_specs=[
                pl.BlockSpec((tb, C, hw_tile), lambda b, h: (b, 0, h)),
                pl.BlockSpec((C, mid), lambda b, h: (0, 0)),
                pl.BlockSpec((mid, C), lambda b, h: (0, 0)),
            ],
            out_specs=pl.BlockSpec((tb, C), lambda b, h: (b, 0)),
            scratch_shapes=[
                pltpu.VMEM((tb, C), jnp.float32),   # running sum
                pltpu.VMEM((tb, C), jnp.float32),   # running max
            ],
        ),
        compiler_params=pltpu.CompilerParams(
            dimension_semantics=("parallel", "arbitrary"),
            vmem_limit_bytes=vmem_bytes,
        ),
        cost_estimate=cost,
    )(x_r, w1t, w2t)

    return out[:B].reshape(B, C, 1, 1)


def _reference(x, w1, w2):
    # Pure-JAX reference of the PyTorch forward.
    avg = jnp.mean(x, axis=(2, 3))                        # (B, C)
    mx = jnp.max(x, axis=(2, 3))                          # (B, C)
    h = avg @ w1.T + mx @ w1.T                            # (B, mid)
    out = jax.nn.sigmoid(h @ w2.T)                        # (B, C)
    return out[:, :, None, None]


if __name__ == "__main__":
    B, in_planes, ratio, H, W = 2, 64, 16, 16, 16
    mid = in_planes // ratio

    key = jax.random.PRNGKey(0)
    kx, k1, k2 = jax.random.split(key, 3)
    x = jax.random.normal(kx, (B, in_planes, H, W), dtype=jnp.float32)
    # Deterministic synthetic weights (Conv2d 1x1, no bias -> plain matrices).
    w1 = 0.1 * jax.random.normal(k1, (mid, in_planes), dtype=jnp.float32)
    w2 = 0.1 * jax.random.normal(k2, (in_planes, mid), dtype=jnp.float32)

    y = channel_attention(x, w1, w2)
    y = jax.block_until_ready(y)

    y_ref = _reference(x, w1, w2)
    assert y.shape == (B, in_planes, 1, 1)
    assert jnp.allclose(y, y_ref, atol=1e-5, rtol=1e-5), "mismatch vs reference"

    print("KERNEL_OK")
</pallas_src>

<mosaic_0001>
module attributes {stable_mosaic.version = 11 : i64} {
  func.func @_channel_attention_kernel(%arg0: i32, %arg1: i32, %arg2: memref<2x64x256xf32, #tpu.memory_space<vmem>>, %arg3: memref<64x4xf32, #tpu.memory_space<vmem>>, %arg4: memref<4x64xf32, #tpu.memory_space<vmem>>, %arg5: memref<2x64xf32, #tpu.memory_space<vmem>>, %arg6: memref<2x64xf32, #tpu.memory_space<vmem>>, %arg7: memref<2x64xf32, #tpu.memory_space<vmem>>) attributes {dimension_semantics = [#tpu.dimension_semantics<parallel>, #tpu.dimension_semantics<arbitrary>], iteration_bounds = array<i64: 1, 1>, scalar_prefetch = 0 : i64, scratch_operands = 2 : i64, tpu.core_type = #tpu.core_type<tc>, window_params = [{transform_indices = @transform_0, window_bounds = array<i64: 2, 64, 256>}, {pipeline_mode = #tpu.pipeline_mode<synchronous>, transform_indices = @transform_1, window_bounds = array<i64: 64, 4>}, {pipeline_mode = #tpu.pipeline_mode<synchronous>, transform_indices = @transform_2, window_bounds = array<i64: 4, 64>}, {transform_indices = @transform_3, window_bounds = array<i64: 2, 64>}]} {
    %c0_i32 = arith.constant 0 : i32
    %0 = arith.cmpi eq, %arg1, %c0_i32 : i32
    %1 = arith.extui %0 : i1 to i32
    %c0_i32_0 = arith.constant 0 : i32
    %2 = arith.cmpi ne, %1, %c0_i32_0 : i32
    scf.if %2 {
      %cst_14 = arith.constant 0.000000e+00 : f32
      %15 = vector.broadcast %cst_14 : f32 to vector<2x64xf32>
      %c0_15 = arith.constant 0 : index
      %c0_16 = arith.constant 0 : index
      %16 = vector.load %arg6[%c0_15, %c0_16] : memref<2x64xf32, #tpu.memory_space<vmem>>, vector<2x64xf32>
      tpu.vector_store %arg6[%c0_15, %c0_16], %15 {strides = array<i32>} : memref<2x64xf32, #tpu.memory_space<vmem>>, vector<2x64xf32>,
      %cst_17 = arith.constant 0xFF800000 : f32
      %17 = vector.broadcast %cst_17 : f32 to vector<2x64xf32>
      %c0_18 = arith.constant 0 : index
      %c0_19 = arith.constant 0 : index
      %18 = vector.load %arg7[%c0_18, %c0_19] : memref<2x64xf32, #tpu.memory_space<vmem>>, vector<2x64xf32>
      tpu.vector_store %arg7[%c0_18, %c0_19], %17 {strides = array<i32>} : memref<2x64xf32, #tpu.memory_space<vmem>>, vector<2x64xf32>,
    } else {
    }
    %c0 = arith.constant 0 : index
    %c0_1 = arith.constant 0 : index
    %c0_2 = arith.constant 0 : index
    %3 = vector.load %arg2[%c0, %c0_1, %c0_2] : memref<2x64x256xf32, #tpu.memory_space<vmem>>, vector<2x64x256xf32>
    %c0_3 = arith.constant 0 : index
    %c0_4 = arith.constant 0 : index
    %4 = vector.load %arg6[%c0_3, %c0_4] : memref<2x64xf32, #tpu.memory_space<vmem>>, vector<2x64xf32>
    %cst = arith.constant dense<0.000000e+00> : vector<2x64xf32>
    %5 = vector.multi_reduction <add>, %3, %cst [2] : vector<2x64x256xf32> to vector<2x64xf32>
    %6 = arith.addf %4, %5 : vector<2x64xf32>
    %c0_5 = arith.constant 0 : index
    %c0_6 = arith.constant 0 : index
    %7 = vector.load %arg6[%c0_5, %c0_6] : memref<2x64xf32, #tpu.memory_space<vmem>>, vector<2x64xf32>
    tpu.vector_store %arg6[%c0_5, %c0_6], %6 {strides = array<i32>} : memref<2x64xf32, #tpu.memory_space<vmem>>, vector<2x64xf32>,
    %c0_7 = arith.constant 0 : index
    %c0_8 = arith.constant 0 : index
    %8 = vector.load %arg7[%c0_7, %c0_8] : memref<2x64xf32, #tpu.memory_space<vmem>>, vector<2x64xf32>
    %cst_9 = arith.constant dense<0xFF800000> : vector<2x64xf32>
    %9 = vector.multi_reduction <maximumf>, %3, %cst_9 [2] : vector<2x64x256xf32> to vector<2x64xf32>
    %10 = arith.maximumf %8, %9 : vector<2x64xf32>
    %c0_10 = arith.constant 0 : index
    %c0_11 = arith.constant 0 : index
    %11 = vector.load %arg7[%c0_10, %c0_11] : memref<2x64xf32, #tpu.memory_space<vmem>>, vector<2x64xf32>
    tpu.vector_store %arg7[%c0_10, %c0_11], %10 {strides = array<i32>} : memref<2x64xf32, #tpu.memory_space<vmem>>, vector<2x64xf32>,
    %c0_i32_12 = arith.constant 0 : i32
    %12 = arith.cmpi eq, %arg1, %c0_i32_12 : i32
    %13 = arith.extui %12 : i1 to i32
    %c0_i32_13 = arith.constant 0 : i32
    %14 = arith.cmpi ne, %13, %c0_i32_13 : i32
    scf.if %14 {
      %c0_14 = arith.constant 0 : index
      %c0_15 = arith.constant 0 : index
      %15 = vector.load %arg6[%c0_14, %c0_15] : memref<2x64xf32, #tpu.memory_space<vmem>>, vector<2x64xf32>
      %cst_16 = arith.constant 3.906250e-03 : f32
      %16 = vector.broadcast %cst_16 : f32 to vector<2x64xf32>
      %17 = arith.mulf %15, %16 : vector<2x64xf32>
      %c0_17 = arith.constant 0 : index
      %c0_18 = arith.constant 0 : index
      %18 = vector.load %arg7[%c0_17, %c0_18] : memref<2x64xf32, #tpu.memory_space<vmem>>, vector<2x64xf32>
      %19 = arith.addf %17, %18 : vector<2x64xf32>
      %c0_19 = arith.constant 0 : index
      %c0_20 = arith.constant 0 : index
      %20 = vector.load %arg3[%c0_19, %c0_20] : memref<64x4xf32, #tpu.memory_space<vmem>>, vector<64x4xf32>
      %c0_21 = arith.constant 0 : index
      %c0_22 = arith.constant 0 : index
      %21 = vector.load %arg4[%c0_21, %c0_22] : memref<4x64xf32, #tpu.memory_space<vmem>>, vector<4x64xf32>
      %cst_23 = arith.constant dense<0.000000e+00> : vector<2x4xf32>
      %22 = tpu.matmul %19, %20, %cst_23 {dimension_numbers = #tpu.dot_dimension_numbers<[1], [0], [0], [1], [0, 0, 1, 1], [], []>} : vector<2x64xf32>, vector<64x4xf32>, vector<2x4xf32> -> vector<2x4xf32>
      %cst_24 = arith.constant dense<0.000000e+00> : vector<2x64xf32>
      %23 = tpu.matmul %22, %21, %cst_24 {dimension_numbers = #tpu.dot_dimension_numbers<[1], [0], [0], [1], [0, 0, 1, 1], [], []>} : vector<2x4xf32>, vector<4x64xf32>, vector<2x64xf32> -> vector<2x64xf32>
      %24 = arith.negf %23 : vector<2x64xf32>
      %25 = math.exp %24 : vector<2x64xf32>
      %cst_25 = arith.constant 1.000000e+00 : f32
      %26 = vector.broadcast %cst_25 : f32 to vector<2x64xf32>
      %27 = arith.addf %26, %25 : vector<2x64xf32>
      %28 = arith.divf %26, %27 : vector<2x64xf32>
      %c0_26 = arith.constant 0 : index
      %c0_27 = arith.constant 0 : index
      %29 = vector.load %arg5[%c0_26, %c0_27] : memref<2x64xf32, #tpu.memory_space<vmem>>, vector<2x64xf32>
      tpu.vector_store %arg5[%c0_26, %c0_27], %28 {strides = array<i32>} : memref<2x64xf32, #tpu.memory_space<vmem>>, vector<2x64xf32>,
    } else {
    }
    return
  }
  func.func @transform_0(%arg0: i32, %arg1: i32) -> (i32, i32, i32) {
    %c0_i32 = arith.constant 0 : i32
    %c0_i32_0 = arith.constant 0 : i32
    return %arg0, %c0_i32, %arg1 : i32, i32, i32
  }
  func.func @transform_1(%arg0: i32, %arg1: i32) -> (i32, i32) {
    %c0_i32 = arith.constant 0 : i32
    %c0_i32_0 = arith.constant 0 : i32
    %c0_i32_1 = arith.constant 0 : i32
    return %c0_i32, %c0_i32_0 : i32, i32
  }
  func.func @transform_2(%arg0: i32, %arg1: i32) -> (i32, i32) {
    %c0_i32 = arith.constant 0 : i32
    %c0_i32_0 = arith.constant 0 : i32
    %c0_i32_1 = arith.constant 0 : i32
    return %c0_i32, %c0_i32_0 : i32, i32
  }
  func.func @transform_3(%arg0: i32, %arg1: i32) -> (i32, i32) {
    %c0_i32 = arith.constant 0 : i32
    %c0_i32_0 = arith.constant 0 : i32
    return %arg0, %c0_i32 : i32, i32
  }
}

</mosaic_0001>

<bundles_post_ra>
// kernel: tpu_custom_call.1
= control target key start
LH: loop header
LB: loop body
LE: loop exit
PB: predicated region body
PF: predicated region fallthrough
CT: control target
= control target key end

     0   :  { %8 = vsyncpa [#allocation5], 0  ;;  %s831_s0 = inlined_call_operand.hbm [shape: f32[2,64,256], index: 0, kind: input, shape index: {}]   ;;  %s832_s1 = inlined_call_operand.vmem [shape: f32[64,4], index: 1, kind: input, shape index: {}]   ;;  %s833_s2 = inlined_call_operand.vmem [shape: f32[4,64], index: 2, kind: input, shape index: {}]   ;;  %s834_s3 = inlined_call_operand.hbm [shape: f32[2,64], index: 3, kind: output, shape index: {}]  }
   0x1   :  { %9 = vsyncpa [#allocation6], 0  ;;  %s664_s12 = smov [#allocation4]  }
   0x2   :  { %s15_s13 = sshll.u32 %s664_s12, 4  ;;  %s16_s13 = int_to_ptr.vmem [resolvable:$true] %s15_s13 }
   0x3   :  { %s628_s14 = scalar_lea.vmem %s16_s13, 4096  ;;  %p633_p1 = scmp.lt.s32.totalorder %s16_s13, %s16_s13 }
   0x4   :  { %p629_p0 = scmp.ne.s32.totalorder %s16_s13, %s628_s14  ;;  %p634_p2 = scmp.lt.s32.totalorder %s628_s14, %s628_s14 }
   0x6   :  { %p635_p3 = por %p634_p2, %p633_p1 }
   0x8   :  { %p636_p4 = pnand %p635_p3, %p629_p0 }
   0xa   :  { %639 = shalt.err (!%p636_p4)
}
   0xb   :  { %s665_s15 = smov 256   ;;  %s666_s16 = smov 16  }
   0xc   :  { %21 = dma.hbm_to_vmem [thread:$0]  %s831_s0, 4096, %s16_s13, [#allocation5], %s665_s15, %s665_s15, %s666_s16  }
   0xd   :  { %660 = dma.done.wait [#allocation5], 4096  }
   0xe   :  { %661 = vsyncadd [#allocation5], 4294963200  ;;  %v52_v0 = vld [vmem:[#allocation4 + $0x80] sm:$0xff]  ;;  %v53_v1 = vld [vmem:[#allocation4 + $0x88] sm:$0xff]  ;;  %vm33_vm0 = vcmask 517120   ;;  %v667_v62 = vmov 0.0  }
   0xf   :  { %v36_v2 = vld [vmem:[#allocation4] sm:$0xff]  ;;  %v93_v3 = vadd.f32 %v53_v1, %v52_v0  ;;  %v37_v4 = vld [vmem:[#allocation4 + $0x8] sm:$0xff]  ;;  %v54_v5 = vld [vmem:[#allocation4 + $0x90] sm:$0xff]  ;;  %v258_v27 = vmax.f32 %v52_v0, %v53_v1  ;;  %34 = vst.msk [vmem:[#allocation2] sm:$0x3] %vm33_vm0, %v667_v62  ;;  %585 = vmatprep.subr.mxu0 %v667_v62  ;;  %604 = vmatprep.subr.mxu1 %v667_v62  ;;  %v668_v1 = vmov -inf  }
  0x10   :  { %v55_v6 = vld [vmem:[#allocation4 + $0x98] sm:$0xff]  ;;  %v69_v7 = vadd.f32 %v37_v4, %v36_v2  ;;  %v38_v8 = vld [vmem:[#allocation4 + $0x10] sm:$0xff]  ;;  %v56_v12 = vld [vmem:[#allocation4 + $0xa0] sm:$0xff]  ;;  %v234_v25 = vmax.f32 %v36_v2, %v37_v4  ;;  %35 = vst.msk [vmem:[#allocation3] sm:$0x3] %vm33_vm0, %v668_v1  ;;  %vm669_vm1 = vmmov 0  }
  0x11   :  { %v39_v9 = vld [vmem:[#allocation4 + $0x18] sm:$0xff]  ;;  %94 = vadd.xlane.f32.xlu1 %v93_v3  ;;  %v96_v10 = vadd.f32 %v55_v6, %v54_v5  ;;  %v57_v13 = vld [vmem:[#allocation4 + $0xa8] sm:$0xff]  ;;  %v40_v14 = vld [vmem:[#allocation4 + $0x20] sm:$0xff]  ;;  %v261_v26 = vmax.f32 %v54_v5, %v55_v6  ;;  %601 = vmatprep.mubr.msk.f32.mxu0 %vm669_vm1, %v667_v62  ;;  %vm144_vm2 = vcmask 130112   ;;  %vm151_vm3 = vcmask 195712   ;;  %s670_s8 = smov [#allocation7]  }
  0x12   :  { %70 = vadd.xlane.f32.xlu0 %v69_v7  ;;  %v72_v11 = vadd.f32 %v39_v9, %v38_v8  ;;  %v41_v15 = vld [vmem:[#allocation4 + $0x28] sm:$0xff]  ;;  %v99_v16 = vadd.f32 %v57_v13, %v56_v12  ;;  %v58_v18 = vld [vmem:[#allocation4 + $0xb0] sm:$0xff]  ;;  %v59_v19 = vld [vmem:[#allocation4 + $0xb8] sm:$0xff]  ;;  %v237_v24 = vmax.f32 %v38_v8, %v39_v9  ;;  %v264_v34 = vmax.f32 %v56_v12, %v57_v13  ;;  %s561_s9 = sshll.u32 %s670_s8, 4  ;;  %s562_s9 = int_to_ptr.vmem [resolvable:$true] %s561_s9 }
  0x13   :  { %v75_v17 = vadd.f32 %v41_v15, %v40_v14  ;;  %v42_v20 = vld [vmem:[#allocation4 + $0x30] sm:$0xff]  ;;  %v43_v21 = vld [vmem:[#allocation4 + $0x38] sm:$0xff]  ;;  %v102_v22 = vadd.f32 %v59_v19, %v58_v18  ;;  %v60_v28 = vld [vmem:[#allocation4 + $0xc0] sm:$0xff]  ;;  %v240_v35 = vmax.f32 %v40_v14, %v41_v15  ;;  %v267_v42 = vmax.f32 %v58_v18, %v59_v19  ;;  %606 = vmatprep.mubr.msk.f32.mxu1 %vm669_vm1, %v667_v62  ;;  %p645_p6 = scmp.lt.s32.totalorder %s562_s9, %s562_s9 }
  0x14   :  { %v78_v23 = vadd.f32 %v43_v21, %v42_v20  ;;  %v61_v29 = vld [vmem:[#allocation4 + $0xc8] sm:$0xff]  ;;  %v44_v30 = vld [vmem:[#allocation4 + $0x40] sm:$0xff]  ;;  %v62_v36 = vld [vmem:[#allocation4 + $0xd0] sm:$0xff]  ;;  %v243_v43 = vmax.f32 %v42_v20, %v43_v21  ;;  %vm158_vm4 = vcmask 261312   ;;  %vm165_vm5 = vcmask 326912  }
  0x15   :  { %97 = vadd.xlane.f32.xlu1 %v96_v10  ;;  %v45_v31 = vld [vmem:[#allocation4 + $0x48] sm:$0xff]  ;;  %v105_v32 = vadd.f32 %v61_v29, %v60_v28  ;;  %v63_v37 = vld [vmem:[#allocation4 + $0xd8] sm:$0xff]  ;;  %v46_v38 = vld [vmem:[#allocation4 + $0x50] sm:$0xff]  ;;  %v270_v50 = vmax.f32 %v60_v28, %v61_v29  ;;  %vm172_vm6 = vcmask 392512   ;;  %vm179_vm7 = vcmask 458112  }
  0x16   :  { %73 = vadd.xlane.f32.xlu0 %v72_v11  ;;  %v81_v33 = vadd.f32 %v45_v31, %v44_v30  ;;  %v47_v39 = vld [vmem:[#allocation4 + $0x58] sm:$0xff]  ;;  %v108_v40 = vadd.f32 %v63_v37, %v62_v36  ;;  %v64_v44 = vld [vmem:[#allocation4 + $0xe0] sm:$0xff]  ;;  %v65_v45 = vld [vmem:[#allocation4 + $0xe8] sm:$0xff]  ;;  %v246_v51 = vmax.f32 %v44_v30, %v45_v31  ;;  %v273_v58 = vmax.f32 %v62_v36, %v63_v37 }
  0x17   :  { %v84_v41 = vadd.f32 %v47_v39, %v46_v38  ;;  %v48_v46 = vld [vmem:[#allocation4 + $0x60] sm:$0xff]  ;;  %v49_v47 = vld [vmem:[#allocation4 + $0x68] sm:$0xff]  ;;  %v111_v48 = vadd.f32 %v65_v45, %v64_v44  ;;  %v66_v52 = vld [vmem:[#allocation4 + $0xf0] sm:$0xff]  ;;  %v249_v59 = vmax.f32 %v46_v38, %v47_v39  ;;  %v276_v60 = vmax.f32 %v64_v44, %v65_v45 }
  0x18   :  { %v87_v49 = vadd.f32 %v49_v47, %v48_v46  ;;  %v67_v53 = vld [vmem:[#allocation4 + $0xf8] sm:$0xff]  ;;  %v50_v54 = vld [vmem:[#allocation4 + $0x70] sm:$0xff]  ;;  %v252_v61 = vmax.f32 %v48_v46, %v49_v47  ;;  %v392_v4 = vld [vmem:[%s832_s1 + $0x28] sm:$0xff]  ;;  %vm186_vm8 = vcmask 523712   ;;  %vm227_vm9 = vcmask 1041409  }
  0x19   :  { %100 = vadd.xlane.f32.xlu1 %v99_v16  ;;  %v51_v55 = vld [vmem:[#allocation4 + $0x78] sm:$0xff]  ;;  %v114_v56 = vadd.f32 %v67_v53, %v66_v52  ;;  %v279_v63 = vmax.f32 %v66_v52, %v67_v53  ;;  %v393_v3 = vld [vmem:[%s832_s1 + $0x30] sm:$0xff]  ;;  %v388_v8 = vld [vmem:[%s832_s1 + $0x8] sm:$0xff]  ;;  %vm396_vm10 = vcmask 523264   ;;  %vm474_vm11 = vcmask 1043456  }
  0x1a   :  { %76 = vadd.xlane.f32.xlu0 %v75_v17  ;;  %v90_v57 = vadd.f32 %v51_v55, %v50_v54  ;;  %v255_v0 = vmax.f32 %v50_v54, %v51_v55  ;;  %v394_v2 = vld [vmem:[%s832_s1 + $0x38] sm:$0xff]  ;;  %v391_v5 = vld [vmem:[%s832_s1 + $0x20] sm:$0xff]  ;;  %v389_v7 = vld [vmem:[%s832_s1 + $0x10] sm:$0xff]  ;;  %vm470_vm12 = vcmask 31744  }
  0x1b   :  { %586 = vmatpush3.msra.mxu0 %v394_v2  ;;  %v390_v6 = vld [vmem:[%s832_s1 + $0x18] sm:$0xff]  ;;  %v387_v9 = vld [vmem:[%s832_s1] sm:$0xff] }
  0x1c   :  { %587 = vmatprep.subr.mxu0 %v667_v62 }
  0x1d   :  { %103 = vadd.xlane.f32.xlu1 %v102_v22  ;;  %588 = vmatpush3.msra.mxu0 %v393_v3 }
  0x1e   :  { %79 = vadd.xlane.f32.xlu0 %v78_v23  ;;  %589 = vmatprep.subr.mxu0 %v667_v62 }
  0x1f   :  { %590 = vmatpush3.msra.mxu0 %v392_v4 }
  0x20   :  { %591 = vmatprep.subr.mxu0 %v667_v62 }
  0x21   :  { %238 = vmax.xlane.f32.xlu1 %v237_v24  ;;  %592 = vmatpush3.msra.mxu0 %v391_v5  ;;  %v133_v24 = vlaneseq }
  0x22   :  { %235 = vmax.xlane.f32.xlu0 %v234_v25  ;;  %593 = vmatprep.subr.mxu0 %v667_v62 }
  0x23   :  { %594 = vmatpush3.msra.mxu0 %v390_v6 }
  0x24   :  { %595 = vmatprep.subr.mxu0 %v667_v62 }
  0x25   :  { %262 = vmax.xlane.f32.xlu1 %v261_v26  ;;  %596 = vmatpush3.msra.mxu0 %v389_v7 }
  0x26   :  { %259 = vmax.xlane.f32.xlu0 %v258_v27  ;;  %597 = vmatprep.subr.mxu0 %v667_v62  ;;  %v134_v27 = vand.u32 127, %v133_v24 }
  0x27   :  { %598 = vmatpush3.msra.mxu0 %v388_v8 }
  0x28   :  { %599 = vmatprep.subr.mxu0 %v667_v62  ;;  %v139_v29 = vadd.s32 4294967288, %v134_v27  ;;  %v146_v31 = vadd.s32 4294967280, %v134_v27  ;;  %v167_v37 = vadd.s32 4294967256, %v134_v27 }
  0x29   :  { %106 = vadd.xlane.f32.xlu1 %v105_v32  ;;  %600 = vmatpush3.msra.mxu0 %v387_v9  ;;  %v136_v32 = vshrl.u32 %v133_v24, 7 }
  0x2a   :  { %82 = vadd.xlane.f32.xlu0 %v81_v33  ;;  %v153_v33 = vadd.s32 4294967272, %v134_v27 }
  0x2b   :  { %v734_v36 = vsub.s32 %v139_v29, %v136_v32  ;;  %v738_v39 = vsub.s32 %v146_v31, %v136_v32  ;;  %v747_v46 = vsub.s32 %v167_v37, %v136_v32 }
  0x2d   :  { %265 = vmax.xlane.f32.xlu1 %v264_v34  ;;  %v160_v34 = vadd.s32 4294967264, %v134_v27 }
  0x2e   :  { %241 = vmax.xlane.f32.xlu0 %v240_v35 }
  0x31   :  { %109 = vadd.xlane.f32.xlu1 %v108_v40  ;;  %v174_v40 = vadd.s32 4294967248, %v134_v27 }
  0x32   :  { %85 = vadd.xlane.f32.xlu0 %v84_v41  ;;  %v740_v41 = vsub.s32 %v134_v27, %v136_v32 }
  0x35   :  { %268 = vmax.xlane.f32.xlu1 %v267_v42  ;;  %v742_v42 = vsub.s32 %v153_v33, %v136_v32 }
  0x36   :  { %244 = vmax.xlane.f32.xlu0 %v243_v43  ;;  %v744_v43 = vsub.s32 %v160_v34, %v136_v32 }
  0x39   :  { %112 = vadd.xlane.f32.xlu1 %v111_v48  ;;  %v181_v48 = vadd.s32 4294967240, %v134_v27 }
  0x3a   :  { %88 = vadd.xlane.f32.xlu0 %v87_v49 }
  0x3d   :  { %271 = vmax.xlane.f32.xlu1 %v270_v50 }
  0x3e   :  { %247 = vmax.xlane.f32.xlu0 %v246_v51  ;;  %v751_v51 = vsub.s32 %v174_v40, %v136_v32 }
  0x41   :  { %115 = vadd.xlane.f32.xlu1 %v114_v56 }
  0x42   :  { %91 = vadd.xlane.f32.xlu0 %v90_v57 }
  0x45   :  { %274 = vmax.xlane.f32.xlu1 %v273_v58 }
  0x46   :  { %250 = vmax.xlane.f32.xlu0 %v249_v59 }
  0x49   :  { %277 = vmax.xlane.f32.xlu1 %v276_v60 }
  0x4a   :  { %253 = vmax.xlane.f32.xlu0 %v252_v61 }
  0x4d   :  { %280 = vmax.xlane.f32.xlu1 %v279_v63  ;;  %v762_v63 = vsub.s32 %v181_v48, %v136_v32 }
  0x4e   :  { %256 = vmax.xlane.f32.xlu0 %v255_v0 }
  0x9a   :  { %v95_v10 = vpop.xlane.xlu1 %94 }
  0x9b   :  { %v71_v11 = vpop.xlane.xlu0 %70  ;;  %v191_v52 = vrot.slane %v95_v10, %v740_v41 }
  0x9c   :  { %v138_v55 = vrot.slane %v71_v11, %v740_v41 }
  0x9e   :  { %v98_v12 = vpop.xlane.xlu1 %97 }
  0x9f   :  { %v74_v13 = vpop.xlane.xlu0 %73  ;;  %v195_v45 = vrot.slane %v98_v12, %v734_v36 }
  0xa0   :  { %v143_v49 = vrot.slane %v74_v13, %v734_v36 }
  0xa1   :  { %v196_v59 = vsel %vm144_vm2, %v195_v45, %v191_v52 }
  0xa2   :  { %v101_v14 = vpop.xlane.xlu1 %100  ;;  %v145_v0 = vsel %vm144_vm2, %v143_v49, %v138_v55 }
  0xa3   :  { %v77_v15 = vpop.xlane.xlu0 %76  ;;  %v200_v50 = vrot.slane %v101_v14, %v738_v39 }
  0xa4   :  { %v150_v53 = vrot.slane %v77_v15, %v738_v39 }
  0xa5   :  { %v201_v1 = vsel %vm151_vm3, %v200_v50, %v196_v59 }
  0xa6   :  { %v104_v16 = vpop.xlane.xlu1 %103  ;;  %v152_v4 = vsel %vm151_vm3, %v150_v53, %v145_v0 }
  0xa7   :  { %v80_v17 = vpop.xlane.xlu0 %79  ;;  %v205_v54 = vrot.slane %v104_v16, %v742_v42 }
  0xa8   :  { %v157_v56 = vrot.slane %v80_v17, %v742_v42 }
  0xa9   :  { %v206_v5 = vsel %vm158_vm4, %v205_v54, %v201_v1 }
  0xaa   :  { %v720_v18 = vpop.xlane.xlu1 %238  ;;  %v159_v7 = vsel %vm158_vm4, %v157_v56, %v152_v4 }
  0xab   :  { %v722_v19 = vpop.xlane.xlu0 %235  ;;  %v305_v32 = vrot.slane %v720_v18, %v734_v36 }
  0xac   :  { %v301_v33 = vrot.slane %v722_v19, %v740_v41 }
  0xae   :  { %v724_v20 = vpop.xlane.xlu1 %262 }
  0xaf   :  { %v726_v21 = vpop.xlane.xlu0 %259 }
  0xb0   :  { %v340_v29 = vrot.slane %v726_v21, %v740_v41 }
  0xb2   :  { %v107_v22 = vpop.xlane.xlu1 %106 }
  0xb3   :  { %v83_v23 = vpop.xlane.xlu0 %82  ;;  %v210_v57 = vrot.slane %v107_v22, %v744_v43 }
  0xb4   :  { %v164_v60 = vrot.slane %v83_v23, %v744_v43  ;;  %v68_v23 = vld [vmem:[#allocation2] sm:$0x3] }
  0xb5   :  { %v211_v8 = vsel %vm165_vm5, %v210_v57, %v206_v5 }
  0xb6   :  { %v728_v25 = vpop.xlane.xlu1 %265  ;;  %v166_v10 = vsel %vm165_vm5, %v164_v60, %v159_v7 }
  0xb7   :  { %v730_v26 = vpop.xlane.xlu0 %241  ;;  %v349_v34 = vrot.slane %v728_v25, %v738_v39 }
  0xb8   :  { %v310_v40 = vrot.slane %v730_v26, %v738_v39  ;;  %v306_v26 = vsel %vm144_vm2, %v305_v32, %v301_v33 }
  0xba   :  { %v110_v28 = vpop.xlane.xlu1 %109 }
  0xbb   :  { %v86_v30 = vpop.xlane.xlu0 %85  ;;  %v215_v61 = vrot.slane %v110_v28, %v747_v46  ;;  %v344_v28 = vrot.slane %v724_v20, %v734_v36 }
  0xbc   :  { %v171_v2 = vrot.slane %v86_v30, %v747_v46 }
  0xbd   :  { %v216_v11 = vsel %vm172_vm6, %v215_v61, %v211_v8  ;;  %v345_v19 = vsel %vm144_vm2, %v344_v28, %v340_v29 }
  0xbe   :  { %v732_v35 = vpop.xlane.xlu1 %268  ;;  %v173_v14 = vsel %vm172_vm6, %v171_v2, %v166_v10  ;;  %v350_v39 = vsel %vm151_vm3, %v349_v34, %v345_v19 }
  0xbf   :  { %v736_v38 = vpop.xlane.xlu0 %244  ;;  %v354_v20 = vrot.slane %v732_v35, %v742_v42 }
  0xc0   :  { %v315_v21 = vrot.slane %v736_v38, %v742_v42  ;;  %v311_v42 = vsel %vm151_vm3, %v310_v40, %v306_v26 }
  0xc1   :  { %v355_v45 = vsel %vm158_vm4, %v354_v20, %v350_v39 }
  0xc2   :  { %v113_v44 = vpop.xlane.xlu1 %112  ;;  %v316_v48 = vsel %vm158_vm4, %v315_v21, %v311_v42 }
  0xc3   :  { %v89_v47 = vpop.xlane.xlu0 %88  ;;  %v220_v3 = vrot.slane %v113_v44, %v751_v51 }
  0xc4   :  { %v178_v6 = vrot.slane %v89_v47, %v751_v51 }
  0xc5   :  { %v221_v15 = vsel %vm179_vm7, %v220_v3, %v216_v11 }
  0xc6   :  { %v272_v58 = vpop.xlane.xlu1 %271  ;;  %v180_v17 = vsel %vm179_vm7, %v178_v6, %v173_v14 }
  0xc7   :  { %v248_v62 = vpop.xlane.xlu0 %247  ;;  %v359_v44 = vrot.slane %v272_v58, %v744_v43  ;;  %v233_v58 = vld [vmem:[#allocation3] sm:$0x3] }
  0xc8   :  { %v320_v36 = vrot.slane %v248_v62, %v744_v43 }
  0xc9   :  { %v360_v43 = vsel %vm165_vm5, %v359_v44, %v355_v45 }
  0xca   :  { %v116_v9 = vpop.xlane.xlu1 %115  ;;  %v321_v50 = vsel %vm165_vm5, %v320_v36, %v316_v48 }
  0xcb   :  { %v225_v12 = vrot.slane %v116_v9, %v762_v63  ;;  %v92_v13 = vpop.xlane.xlu0 %91 }
  0xcc   :  { %v185_v16 = vrot.slane %v92_v13, %v762_v63 }
  0xcd   :  { %v226_v22 = vsel %vm186_vm8, %v225_v12, %v221_v15 }
  0xce   :  { %v187_v24 = vsel %vm186_vm8, %v185_v16, %v180_v17  ;;  %v275_v27 = vpop.xlane.xlu1 %274 }
  0xcf   :  { %v228_v30 = vsel %vm227_vm9, %v226_v22, %v187_v24  ;;  %v251_v31 = vpop.xlane.xlu0 %250  ;;  %v364_v25 = vrot.slane %v275_v27, %v747_v46 }
  0xd0   :  { %v230_v37 = vadd.f32 %v228_v30, %v68_v23  ;;  %v325_v35 = vrot.slane %v251_v31, %v747_v46 }
  0xd1   :  { %v365_v52 = vsel %vm172_vm6, %v364_v25, %v360_v43 }
  0xd2   :  { %232 = vst.msk [vmem:[#allocation2] sm:$0x3] %vm33_vm0, %v230_v37  ;;  %v278_v18 = vpop.xlane.xlu1 %277  ;;  %v326_v54 = vsel %vm172_vm6, %v325_v35, %v321_v50 }
  0xd3   :  { %v254_v41 = vpop.xlane.xlu0 %253  ;;  %v369_v38 = vrot.slane %v278_v18, %v751_v51 }
  0xd4   :  { %v330_v47 = vrot.slane %v254_v41, %v751_v51 }
  0xd5   :  { %v370_v55 = vsel %vm179_vm7, %v369_v38, %v365_v52 }
  0xd6   :  { %v281_v49 = vpop.xlane.xlu1 %280  ;;  %v331_v51 = vsel %vm179_vm7, %v330_v47, %v326_v54 }
  0xd7   :  { %v374_v53 = vrot.slane %v281_v49, %v762_v63  ;;  %v257_v46 = vpop.xlane.xlu0 %256 }
  0xd8   :  { %v335_v56 = vrot.slane %v257_v46, %v762_v63  ;;  %v395_v63 = vld [vmem:[%s833_s2] sm:$0xf]  ;;  %s640_s2 = scalar_lea.vmem %s562_s9, 32 }
  0xd9   :  { %v375_v57 = vsel %vm186_vm8, %v374_v53, %v370_v55  ;;  %v383_v62 = vld [vmem:[#allocation2] sm:$0x3]  ;;  %605 = vmatpush3.msk.msra.mxu1 %vm474_vm11, %v395_v63  ;;  %p641_p5 = scmp.ne.s32.totalorder %s562_s9, %s640_s2  ;;  %p646_p7 = scmp.lt.s32.totalorder %s640_s2, %s640_s2 }
  0xda   :  { %v336_v59 = vsel %vm186_vm8, %v335_v56, %v331_v51  ;;  %v384_v0 = vmul.f32 0.00390625, %v383_v62 }
  0xdb   :  { %v376_v60 = vsel %vm227_vm9, %v375_v57, %v336_v59  ;;  %p647_p8 = por %p646_p7, %p645_p6 }
  0xdc   :  { %v378_v61 = vmax.f32 %v233_v58, %v376_v60 }
  0xdd   :  { %p648_p9 = pnand %p647_p8, %p641_p5 }
  0xde   :  { %379 = vst.msk [vmem:[#allocation3] sm:$0x3] %vm33_vm0, %v378_v61 }
  0xe5   :  { %v385_v1 = vld [vmem:[#allocation3] sm:$0x3] }
  0xe6   :  { %v386_v2 = vadd.f32 %v385_v1, %v384_v0 }
  0xe8   :  { %602 = vmatmul.mubr.msk.f32.vlgmr.msra.gmra.mxu0 %vm396_vm10, %v386_v2 }
 0x1a8   :  { %v466_v3 = vpop.f32.mrf.mxu0 }
 0x1a9   :  { %607 = vmatmul.mubr.msk.f32.vlgmr.msra.gmra.mxu1 %vm470_vm12, %v466_v3 }
 0x1aa   :  { %v603_v4 = vpop.f32.mrf.mxu0 }
 0x269   :  { %v544_v5 = vpop.f32.mrf.mxu1 }
 0x26a   :  { %v573_v6 = vmul.f32 -1.442695, %v544_v5 }
 0x26b   :  { %v608_v7 = vpop.f32.mrf.mxu1 }
 0x26c   :  { %616 = vpow2.f32 %v573_v6 }
 0x279   :  { %v617_v8 = vpop.eup %616 }
 0x27a   :  { %v551_v9 = vadd.f32 1.0, %v617_v8 }
 0x27c   :  { %618 = vrcp.f32 %v551_v9 }
 0x289   :  { %v619_v10 = vpop.eup %618 }
 0x28a   :  { %554 = vst.msk [vmem:[#allocation7] sm:$0x3] %vm33_vm0, %v619_v10 }
 0x28b   :  { %651 = shalt.err (!%p648_p9)
}
 0x28c   :  { %564 = dma.vmem_to_hbm [thread:$0]  %s562_s9, 32, %s834_s3, [#allocation6]  }
 0x28d   :  { %662 = dma.done.wait [#allocation6], 32  }
 0x28e   :  { %663 = vsyncadd [#allocation6], 4294967264 }
 0x28f   :  { %568 = vsyncpa [#allocation5], 1 }
 0x290   :  { %569 = vsyncpa [#allocation6], 1 }

</bundles_post_ra>
